<compile_context>
chip_gen: v7x
topology: tpu7x:2x2x1
jax: 0.10.0
libtpu: 0.0.40
codegen_flags: <defaults>
</compile_context>

<pallas_src>
import jax
import jax.numpy as jnp
import numpy as np
from jax.experimental import pallas as pl
from jax.experimental.pallas import tpu as pltpu


def _embeddings_kernel(patches_ref, w_ref, pos_ref, out_ref):
    # patches_ref: (Bt, NPOS, Kp) bf16 -- row 0 of each image is the one-hot
    #                                     class-token selector, rows 1.. are
    #                                     flattened patches (zero-padded in K).
    # w_ref:       (Kp, D)        bf16 -- flattened conv weight; row K holds
    #                                     the class embedding; trailing rows 0.
    # pos_ref:     (NPOS, D)      f32  -- full position-embedding table.
    # out_ref:     (Bt, NPOS, D)
    w = w_ref[...]
    pos = pos_ref[...]
    bt = out_ref.shape[0]
    for b in range(bt):  # static unroll over the batch tile
        emb = jnp.dot(patches_ref[b], w,
                      preferred_element_type=jnp.float32)   # (NPOS, D) on MXU
        # Single aligned store: class row comes out of the matmul too.
        out_ref[b] = (emb + pos).astype(out_ref.dtype)


def _pick_batch_tile(B, NPOS, Kp, D, out_bytes, budget_bytes=24 * 1024 * 1024):
    """Largest divisor of B that fits the VMEM budget, capped at B//2 so the
    grid keeps >=2 parallel steps when possible (v7x megacore)."""
    # Constant-index operands (weight + pos table), worst case double-buffered.
    const_bytes = 2 * (Kp * D * 2 + NPOS * D * 4)
    # Per-image double-buffered input block (bf16) + output block.
    per_b = 2 * (NPOS * Kp * 2 + NPOS * D * out_bytes)
    avail = max(budget_bytes - const_bytes, per_b)
    max_bt = max(1, avail // per_b)
    if B >= 2:
        max_bt = min(max_bt, max(1, B // 2))
    bt = 1
    for d in range(1, B + 1):
        if B % d == 0 and d <= max_bt:
            bt = d
    return bt


def clip_vision_embeddings(pixel_values, patch_weight, class_embedding,
                           position_embedding, patch_size, out_dtype=None):
    """pixel_values: [B, C, H, W]; patch_weight: [D, C, P, P] (Conv2d weight,
    no bias); class_embedding: [D]; position_embedding: [NPOS, D]."""
    B, C, H, W = pixel_values.shape
    D = patch_weight.shape[0]
    P = patch_size
    Hp, Wp = H // P, W // P
    NP = Hp * Wp
    NPOS = NP + 1
    K = C * P * P
    # One extra column carries the class-token one-hot; pad to a lane multiple.
    Kp = ((K + 1 + 127) // 128) * 128
    if out_dtype is None:
        out_dtype = position_embedding.dtype  # f32 default == module semantics

    # --- wrapper glue: im2col (stride-P conv == patch extraction), bf16.
    # pad + one-hot-row concat fuse into the same cast/transpose pass.
    x = pixel_values.astype(jnp.bfloat16).reshape(B, C, Hp, P, Wp, P)
    x = jnp.transpose(x, (0, 2, 4, 1, 3, 5))            # [B, Hp, Wp, C, P, P]
    patches = x.reshape(B, NP, K)                        # [B, NP, K] bf16
    patches = jnp.pad(patches, ((0, 0), (0, 0), (0, Kp - K)))   # cols K.. = 0
    onehot = jnp.zeros((Kp,), jnp.bfloat16).at[K].set(1.0)
    onehot = jnp.broadcast_to(onehot[None, None, :], (B, 1, Kp))
    patches_aug = jnp.concatenate([onehot, patches], axis=1)    # [B, NPOS, Kp]

    w = patch_weight.reshape(D, K).T.astype(jnp.bfloat16)       # [K, D]
    cls_row = class_embedding.reshape(1, D).astype(jnp.bfloat16)
    w_aug = jnp.concatenate(
        [w, cls_row, jnp.zeros((Kp - K - 1, D), jnp.bfloat16)], axis=0)  # [Kp, D]

    pos = position_embedding.astype(jnp.float32)                # [NPOS, D]

    out_bytes = jnp.dtype(out_dtype).itemsize
    Bt = _pick_batch_tile(B, NPOS, Kp, D, out_bytes)

    out = pl.pallas_call(
        _embeddings_kernel,
        out_shape=jax.ShapeDtypeStruct((B, NPOS, D), out_dtype),
        grid_spec=pltpu.PrefetchScalarGridSpec(
            num_scalar_prefetch=0,
            grid=(B // Bt,),
            in_specs=[
                pl.BlockSpec((Bt, NPOS, Kp), lambda b: (b, 0, 0)),
                # Constant-index blocks: Pallas only DMAs them once (the block
                # index never changes across the grid).
                pl.BlockSpec((Kp, D), lambda b: (0, 0)),
                pl.BlockSpec((NPOS, D), lambda b: (0, 0)),
            ],
            out_specs=pl.BlockSpec((Bt, NPOS, D), lambda b: (b, 0, 0)),
        ),
        compiler_params=pltpu.CompilerParams(
            dimension_semantics=("parallel",),
            vmem_limit_bytes=32 * 1024 * 1024,
        ),
    )(patches_aug, w_aug, pos)
    return out


def _reference(pixel_values, patch_weight, class_embedding, position_embedding,
               patch_size):
    # Pure-JAX f32 reference matching the PyTorch forward (conv + concat + add).
    B = pixel_values.shape[0]
    D = patch_weight.shape[0]
    conv = jax.lax.conv_general_dilated(
        pixel_values.astype(jnp.float32),
        patch_weight.astype(jnp.float32),
        window_strides=(patch_size, patch_size),
        padding="VALID",
        dimension_numbers=("NCHW", "OIHW", "NCHW"),
    )  # [B, D, Hp, Wp]
    patch_embeds = conv.reshape(B, D, -1).transpose(0, 2, 1)  # [B, NP, D]
    class_embeds = jnp.broadcast_to(class_embedding.reshape(1, 1, D),
                                    (B, 1, D))
    emb = jnp.concatenate([class_embeds, patch_embeds], axis=1)
    return emb + position_embedding[None, :, :]


if __name__ == "__main__":
    # Small config consistent with the module: CLIP-style vision embeddings.
    batch = 2
    num_channels = 3
    image_size = 16
    patch_size = 4
    hidden_size = 128
    num_patches = (image_size // patch_size) ** 2
    num_positions = num_patches + 1

    key = jax.random.PRNGKey(0)
    k_x, k_cls, k_patch, k_pos = jax.random.split(key, 4)

    pixel_values = jax.random.normal(
        k_x, (batch, num_channels, image_size, image_size), dtype=jnp.float32)
    # Deterministic parameter init (shapes from nn.Module __init__):
    class_embedding = jax.random.normal(k_cls, (hidden_size,), dtype=jnp.float32)
    patch_weight = 0.02 * jax.random.normal(
        k_patch, (hidden_size, num_channels, patch_size, patch_size),
        dtype=jnp.float32)
    position_embedding = 0.02 * jax.random.normal(
        k_pos, (num_positions, hidden_size), dtype=jnp.float32)

    out = clip_vision_embeddings(pixel_values, patch_weight, class_embedding,
                                 position_embedding, patch_size)
    out = jax.block_until_ready(out)

    ref = _reference(pixel_values, patch_weight, class_embedding,
                     position_embedding, patch_size)
    # bf16 MXU operands (f32 accumulation), and the class token now flows
    # through a bf16 weight row -> loosen tolerance vs the f32 reference.
    np.testing.assert_allclose(np.asarray(out), np.asarray(ref),
                               rtol=2e-2, atol=2e-2)
    assert out.shape == (batch, num_positions, hidden_size)
    print("KERNEL_OK")
</pallas_src>

<mosaic_0001>
module attributes {stable_mosaic.version = 11 : i64} {
  func.func @_embeddings_kernel(%arg0: i32, %arg1: memref<1x17x128xbf16, #tpu.memory_space<vmem>>, %arg2: memref<128x128xbf16, #tpu.memory_space<vmem>>, %arg3: memref<17x128xf32, #tpu.memory_space<vmem>>, %arg4: memref<1x17x128xf32, #tpu.memory_space<vmem>>) attributes {dimension_semantics = [#tpu.dimension_semantics<parallel>], iteration_bounds = array<i64: 2>, scalar_prefetch = 0 : i64, scratch_operands = 0 : i64, tpu.core_type = #tpu.core_type<tc>, window_params = [{transform_indices = @transform_0, window_bounds = array<i64: 1, 17, 128>}, {pipeline_mode = #tpu.pipeline_mode<synchronous>, transform_indices = @transform_1, window_bounds = array<i64: 128, 128>}, {pipeline_mode = #tpu.pipeline_mode<synchronous>, transform_indices = @transform_2, window_bounds = array<i64: 17, 128>}, {transform_indices = @transform_3, window_bounds = array<i64: 1, 17, 128>}]} {
    %c0 = arith.constant 0 : index
    %c0_0 = arith.constant 0 : index
    %0 = vector.load %arg2[%c0, %c0_0] : memref<128x128xbf16, #tpu.memory_space<vmem>>, vector<128x128xbf16>
    %c0_1 = arith.constant 0 : index
    %c0_2 = arith.constant 0 : index
    %1 = vector.load %arg3[%c0_1, %c0_2] : memref<17x128xf32, #tpu.memory_space<vmem>>, vector<17x128xf32>
    %c0_3 = arith.constant 0 : index
    %c0_4 = arith.constant 0 : index
    %c0_5 = arith.constant 0 : index
    %2 = vector.load %arg1[%c0_3, %c0_4, %c0_5] : memref<1x17x128xbf16, #tpu.memory_space<vmem>>, vector<1x17x128xbf16>
    %3 = vector.shape_cast %2 : vector<1x17x128xbf16> to vector<17x128xbf16>
    %cst = arith.constant dense<0.000000e+00> : vector<17x128xf32>
    %4 = tpu.matmul %3, %0, %cst {dimension_numbers = #tpu.dot_dimension_numbers<[1], [0], [0], [1], [0, 0, 1, 1], [], []>} : vector<17x128xbf16>, vector<128x128xbf16>, vector<17x128xf32> -> vector<17x128xf32>
    %5 = arith.addf %4, %1 : vector<17x128xf32>
    %c0_6 = arith.constant 0 : index
    %c0_7 = arith.constant 0 : index
    %c0_8 = arith.constant 0 : index
    %6 = vector.load %arg4[%c0_6, %c0_7, %c0_8] : memref<1x17x128xf32, #tpu.memory_space<vmem>>, vector<1x17x128xf32>
    %7 = vector.shape_cast %6 : vector<1x17x128xf32> to vector<17x128xf32>
    %8 = vector.shape_cast %5 : vector<17x128xf32> to vector<1x17x128xf32>
    tpu.vector_store %arg4[%c0_6, %c0_7, %c0_8], %8 {strides = array<i32>} : memref<1x17x128xf32, #tpu.memory_space<vmem>>, vector<1x17x128xf32>,
    return
  }
  func.func @transform_0(%arg0: i32) -> (i32, i32, i32) {
    %c0_i32 = arith.constant 0 : i32
    %c0_i32_0 = arith.constant 0 : i32
    %c0_i32_1 = arith.constant 0 : i32
    return %arg0, %c0_i32, %c0_i32_0 : i32, i32, i32
  }
  func.func @transform_1(%arg0: i32) -> (i32, i32) {
    %c0_i32 = arith.constant 0 : i32
    %c0_i32_0 = arith.constant 0 : i32
    %c0_i32_1 = arith.constant 0 : i32
    return %c0_i32, %c0_i32_0 : i32, i32
  }
  func.func @transform_2(%arg0: i32) -> (i32, i32) {
    %c0_i32 = arith.constant 0 : i32
    %c0_i32_0 = arith.constant 0 : i32
    %c0_i32_1 = arith.constant 0 : i32
    return %c0_i32, %c0_i32_0 : i32, i32
  }
  func.func @transform_3(%arg0: i32) -> (i32, i32, i32) {
    %c0_i32 = arith.constant 0 : i32
    %c0_i32_0 = arith.constant 0 : i32
    %c0_i32_1 = arith.constant 0 : i32
    return %arg0, %c0_i32, %c0_i32_0 : i32, i32, i32
  }
}

</mosaic_0001>

<bundles_post_ra>
// kernel: tpu_custom_call.1
= control target key start
LH: loop header
LB: loop body
LE: loop exit
PB: predicated region body
PF: predicated region fallthrough
CT: control target
= control target key end

     0   :  { %8 = vsyncpa [#allocation3], 0  ;;  %s532_s12 = smov 0   ;;  %s601_s0 = inlined_call_operand.vmem [shape: bf16[2,17,128], index: 0, kind: input, shape index: {}]   ;;  %s602_s1 = inlined_call_operand.hbm [shape: bf16[128,128], index: 1, kind: input, shape index: {}]   ;;  %s603_s2 = inlined_call_operand.vmem [shape: f32[17,128], index: 2, kind: input, shape index: {}]   ;;  %s604_s3 = inlined_call_operand.vmem [shape: f32[2,17,128], index: 3, kind: output, shape index: {}]  }
   0x1 LB: > { %s538_s13 = sadd.s32 4294967295, %s507_s12   ;;  %p387_p0 = scmp.ge.s32.totalorder %s507_s12, 1  ;;  %s507_s12 = sphi %s532_s12, %s14_s12  }
   0x2   : > { %p113_p1 = scmp.lt.s32.totalorder %s507_s12, 3  ;;  %s509_s14 = smov [#allocation2]  }
   0x3   : > { %s125_s15 = sshll.u32 %s509_s14, 4  ;;  %p605_p3 = scmp.eq.s32.totalorder %s538_s13, 0  ;;  %s126_s15 = int_to_ptr.vmem [resolvable:$true] %s125_s15 }
   0x4   : > { %p542_p2 = pnand %p387_p0, %p113_p1  ;;  %s469_s20 = scalar_lea.hbm %s602_s1, 1024 }
   0x5   : > { %p470_p6 = scmp.ne.s32.totalorder %s602_s1, %s469_s20  ;;  %p476_p10 = scmp.lt.u32.totalorder %s469_s20, %s602_s1 }
   0x6   : > { %s607_s16 = scalar_select %p542_p2, 1, 0 }
   0x7   : > { %p442_p4 = pneg %p542_p2 }
   0x9   : > { %p551_p5 = pnand %p605_p3, %p442_p4 }
   0xb   : > { %p471_p7 = pneg %p551_p5 }
   0xd   : > { %p472_p8 = pnand %p471_p7, %p470_p6 }
   0xf   : > { %p473_p9 = pneg %p472_p8 }
  0x11   : > { %p478_p11 = pnand %p476_p10, %p473_p9 }
  0x13   : > { %481 = shalt.err (!%p478_p11)
}
  0x14   : > { %s482_s25 = scalar_lea.vmem %s126_s15, 1024  ;;  %p490_p1 = scmp.lt.s32.totalorder %s126_s15, %s126_s15 }
  0x15   : > { %p483_p12 = scmp.ne.s32.totalorder %s126_s15, %s482_s25  ;;  %p491_p4 = scmp.lt.s32.totalorder %s482_s25, %s482_s25 }
  0x17   : > { %p485_p13 = pnand %p483_p12, %p471_p7  ;;  %p492_p3 = por %p491_p4, %p490_p1 }
  0x19   : > { %p486_p0 = pneg %p485_p13 }
  0x1b   : > { %p493_p2 = pnand %p492_p3, %p486_p0 }
  0x1d   : > { %496 = shalt.err (!%p493_p2)
}
  0x1e   : > { %s510_s26 = smov 64   ;;  %s511_s27 = smov 4  }
  0x1f   : > { %445 = dma.hbm_to_vmem [thread:$0]  (!%p551_p5), %s602_s1, 1024, %s126_s15, [#allocation3], %s510_s26, %s510_s26, %s511_s27  }
  0x20   : > { %p609_p6 = scmp.ne.s32.totalorder %s607_s16, 0 }
  0x21   : > { %p610_p8 = scmp.eq.s32.totalorder (!%p609_p6), %s538_s13, 0 }
  0x22   : > { %152 = sbr.rel (%p609_p6) target bundleno = 293 (0x125), region = 32 }
  0x29   : > { %502 = dma.done.wait (%p610_p8), [#allocation3], 1024   ;;  %p611_p7 = pmov %p610_p8 }
  0x2a   : > { %p176_p2 = scmp.lt.s32.totalorder %s538_s13, 1  ;;  %v459_v0 = vld [vmem:[#allocation2] sm:$0xff]   ;;  %v460_v1 = vld [vmem:[#allocation2 + $0x8] sm:$0xff]   ;;  %v461_v2 = vld [vmem:[#allocation2 + $0x10] sm:$0xff]  }
  0x2b   : > { %504 = vsyncadd (%p611_p7), [#allocation3], 4294966272  ;;  %416 = vmatprep.subr.bf16.mxu0 %v459_v0  ;;  %v462_v3 = vld [vmem:[#allocation2 + $0x18] sm:$0xff]   ;;  %v463_v5 = vld [vmem:[#allocation2 + $0x20] sm:$0xff]  }
  0x2c   : > { %s613_s13 = smov (!%p176_p2, %s538_s13), 1  ;;  %417 = vmatpush3.bf16.msra.mxu0 %v459_v0  ;;  %v464_v6 = vld [vmem:[#allocation2 + $0x28] sm:$0xff]   ;;  %v465_v7 = vld [vmem:[#allocation2 + $0x30] sm:$0xff]   ;;  %v466_v8 = vld [vmem:[#allocation2 + $0x38] sm:$0xff]  }
  0x2d   : > { %s436_s30 = smul.u32 12, %s613_s13  ;;  %418 = vmatprep.subr.bf16.mxu0 %v460_v1  ;;  %v205_v10 = vld [vmem:[%s603_s2 + $0x10] sm:$0x1]  ;;  %v203_v11 = vld [vmem:[%s603_s2] sm:$0xff]  ;;  %v204_v15 = vld [vmem:[%s603_s2 + $0x8] sm:$0xff] }
  0x2e   : > { %s437_s7 = smul.u32 24, %s613_s13 }
  0x2f   : > { %s180_s6 = scalar_lea.vmem %s601_s0, %s436_s30 }
  0x30   : > { %419 = vmatpush3.bf16.msra.mxu0 %v460_v1  ;;  %v467_v4 = vld [vmem:[%s180_s6] sm:$0xff]   ;;  %v468_v9 = vld [vmem:[%s180_s6 + $0x8] ss:$0 sps:$4 sm:$0x11]   ;;  %s185_s16 = scalar_lea.vmem %s604_s3, %s437_s7 }
  0x31   : > { %420 = vmatprep.subr.bf16.mxu0 %v461_v2  ;;  %432 = vmatprep.mubr.bf16.mxu0 %v467_v4 }
  0x34   : > { %421 = vmatpush3.bf16.msra.mxu0 %v461_v2 }
  0x35   : > { %422 = vmatprep.subr.bf16.mxu0 %v462_v3 }
  0x38   : > { %423 = vmatpush3.bf16.msra.mxu0 %v462_v3 }
  0x39   : > { %424 = vmatprep.subr.bf16.mxu0 %v463_v5 }
  0x3c   : > { %425 = vmatpush3.bf16.msra.mxu0 %v463_v5 }
  0x3d   : > { %426 = vmatprep.subr.bf16.mxu0 %v464_v6 }
  0x40   : > { %427 = vmatpush3.bf16.msra.mxu0 %v464_v6 }
  0x41   : > { %428 = vmatprep.subr.bf16.mxu0 %v465_v7 }
  0x44   : > { %429 = vmatpush3.bf16.msra.mxu0 %v465_v7 }
  0x45   : > { %430 = vmatprep.subr.bf16.mxu0 %v466_v8 }
  0x48   : > { %431 = vmatpush3.bf16.msra.mxu0 %v466_v8 }
  0x4b   : > { %433 = vmatmul.mubr.bf16.vlgmr.msra.gmra.mrb[0].mxu0 %v468_v9 }
 0x11e   : > { %v434_v12 = vpop.f32.mrb[0].mxu0 }
 0x11f   : > { %v310_v13 = vadd.f32 %v434_v12, %v205_v10  ;;  %v301_v14 = vpop.f32.mrb[1].mxu0 }
 0x120   : > { %v302_v16 = vadd.f32 %v301_v14, %v203_v11  ;;  %v435_v17 = vpop.f32.mrb[2].mxu0 }
 0x121   : > { %317 = vst [vmem:[%s185_s16 + $0x10] sm:$0x1] %v310_v13  ;;  %v304_v18 = vpop.f32.mrb[3].mxu0 }
 0x122   : > { %315 = vst [vmem:[%s185_s16] sm:$0xff] %v302_v16  ;;  %v305_v19 = vadd.f32 %v304_v18, %v204_v15 }
 0x124   : > { %316 = vst [vmem:[%s185_s16 + $0x8] sm:$0xff] %v305_v19 }
 0x125 PF: > { %s14_s12 = sadd.s32 1, %s507_s12  }
 0x126   : > { %p11_p3 = scmp.ge.s32.totalorder %s14_s12, 4  }
 0x128   :  { %13 = sbr.rel (!%p11_p3) target bundleno = 1 (0x1), region = 67 }
 0x12f   :  { %339 = vsyncpa [#allocation3], 1 }
 0x130   :  { %341 = vsyncpa [#allocation3 + $0x1], 1 }

</bundles_post_ra>
